<compile_context>
chip_gen: v7x
topology: tpu7x:2x2x1
jax: 0.10.0
libtpu: 0.0.40
codegen_flags: <defaults>
</compile_context>

<pallas_src>
import math

import jax
import jax.numpy as jnp
from jax.experimental import pallas as pl
from jax.experimental.pallas import tpu as pltpu

_LANE = 128
# Total VMEM budget for the pipelined block set: 3 arrays (1 in + 2 out) x 2 buffers.
_VMEM_BUDGET_BYTES = 8 * 1024 * 1024
# Above this total size, force the grid to have >= 2 steps (v7x has 2 TensorCores).
_MULTI_STEP_BYTES = 2 * 1024 * 1024
# Below this total size, skip the kernel and let XLA fuse two elementwise ops.
_SMALL_TENSOR_BYTES = 512 * 1024
# Largest lane-chunk (columns) we ever put in one block.
_MAX_TILE_C = 8192


def _lagrangian_kernel(scalars_ref, x_ref, dual_loss_ref, reg_loss_ref):
    """Elementwise Lagrangian loss terms for one (tile_r, tile_c) block.

    scalars_ref (SMEM, f32[2]) = [dual, dual * inequality_zero]
    """
    dual = scalars_ref[0]
    dual_c = scalars_ref[1]
    # f32 scalar * x promotes the math to f32; cast explicitly on store so
    # bf16/f16 inputs lower cleanly (mem-bound: the f32 math is free).
    prod = dual * x_ref[...]                     # dual() * g(x), reused twice
    reg_loss_ref[...] = prod.astype(reg_loss_ref.dtype)
    dual_loss_ref[...] = (dual_c - prod).astype(dual_loss_ref.dtype)


def _sublane(dtype):
    """Dtype-aware sublane multiple: 8 for f32, 16 for bf16, 32 for int8/fp8."""
    itemsize = jnp.dtype(dtype).itemsize
    return max(8, 8 * (4 // itemsize))


def _pick_tiles(num_rows, num_cols, itemsize, sub, total_bytes):
    """Choose (tile_r, tile_c) under the VMEM budget; ragged edges are masked."""
    # Column tile: full C when it is lane-aligned and modest, else a large
    # multiple of 128 (last column block masked via cdiv grid).
    if num_cols % _LANE == 0 and num_cols <= _MAX_TILE_C:
        tile_c = num_cols
    else:
        tile_c = max(_LANE, min(_MAX_TILE_C, (num_cols // _LANE) * _LANE))
        tile_c = min(tile_c, num_cols) if num_cols >= _LANE else num_cols

    # Row tile: as many sublane-aligned rows as fit the 3-array x 2-buffer budget.
    bytes_per_row = 6 * tile_c * itemsize
    max_rows = max(sub, (_VMEM_BUDGET_BYTES // bytes_per_row) // sub * sub)
    tile_r = min(max_rows, num_rows)

    # Force >= 2 grid steps for larger arrays (megacore on v7x) when the column
    # axis contributes only a single step.
    if total_bytes > _MULTI_STEP_BYTES and tile_c >= num_cols:
        half = pl.cdiv(pl.cdiv(num_rows, 2), sub) * sub
        tile_r = min(tile_r, half)

    if tile_r < num_rows:
        tile_r = max(sub, (tile_r // sub) * sub)  # sublane-aligned unless full dim
    return tile_r, tile_c


def _lane_dense_view(x):
    """Return (x2d, pad) where x2d is a lane-dense 2-D view/reshape of x."""
    if x.ndim >= 2 and x.shape[-1] >= _LANE:
        return x.reshape(-1, x.shape[-1]), 0
    flat = x.reshape(-1)
    n = flat.size
    pad = (-n) % _LANE
    if pad:
        flat = jnp.pad(flat, (0, pad))
    n_pad = n + pad
    cols = _LANE
    for cand in (8192, 4096, 2048, 1024, 512, 256):
        if n_pad % cand == 0:
            cols = cand
            break
    return flat.reshape(-1, cols), pad


def lagrangian_loss(inequality_value, raw_dual, inequality_zero=0.0,
                    regularization=False,
                    small_tensor_bytes=_SMALL_TENSOR_BYTES):
    """Return (dual_loss, reg_loss), each with the shape/dtype of `inequality_value`."""
    x = jnp.asarray(inequality_value)
    out_dtype = x.dtype

    # Trivial branch of forward(): empty Loss() -> zero loss terms.
    # (Only fires for static Python scalars, matching the PyTorch attribute.)
    if (isinstance(inequality_zero, (int, float)) and float(inequality_zero) == 0.0
            and not regularization):
        z = jnp.zeros_like(x)
        return z, z

    if x.size == 0:
        z = jnp.zeros_like(x)
        return z, z

    # dual() hoisted out of the kernel: numerically stable softplus (positive
    # parametrization) in constraint mode, plain constant in regularization mode.
    raw = jnp.asarray(raw_dual, jnp.float32)
    dual = raw if regularization else jax.nn.softplus(raw)
    c = jnp.asarray(inequality_zero, jnp.float32)

    itemsize = x.dtype.itemsize
    total_bytes = x.size * itemsize

    # Small-tensor bail-out: fixed pallas_call + DMA-setup overhead dominates;
    # two fused XLA elementwise ops are strictly faster and fuse with neighbors.
    if total_bytes <= small_tensor_bytes:
        prod = dual * x.astype(jnp.float32)
        reg_loss = prod.astype(out_dtype)
        dual_loss = (dual * c - prod).astype(out_dtype)
        return dual_loss, reg_loss

    scalars = jnp.stack([dual, dual * c])  # [dual, dual*c] -> SMEM via prefetch

    orig_shape = x.shape
    x2, pad = _lane_dense_view(x)
    rows, cols = x2.shape

    sub = _sublane(x.dtype)
    tile_r, tile_c = _pick_tiles(rows, cols, itemsize, sub, total_bytes)
    grid = (pl.cdiv(rows, tile_r), pl.cdiv(cols, tile_c))
    tile_spec = pl.BlockSpec((tile_r, tile_c), lambda i, j, s: (i, j))

    dual_loss2, reg_loss2 = pl.pallas_call(
        _lagrangian_kernel,
        out_shape=(jax.ShapeDtypeStruct((rows, cols), out_dtype),
                   jax.ShapeDtypeStruct((rows, cols), out_dtype)),
        grid_spec=pltpu.PrefetchScalarGridSpec(
            num_scalar_prefetch=1,
            grid=grid,
            in_specs=[tile_spec],
            out_specs=[tile_spec, tile_spec],
        ),
        compiler_params=pltpu.CompilerParams(
            dimension_semantics=("parallel", "parallel")),
        cost_estimate=pl.CostEstimate(
            flops=2 * rows * cols,
            transcendentals=0,
            bytes_accessed=3 * rows * cols * itemsize),
    )(scalars, x2)

    if pad:
        dual_loss2 = dual_loss2.reshape(-1)[: x.size]
        reg_loss2 = reg_loss2.reshape(-1)[: x.size]
    return dual_loss2.reshape(orig_shape), reg_loss2.reshape(orig_shape)


def _reference(x, raw_dual, inequality_zero, regularization):
    raw = jnp.asarray(raw_dual, jnp.float32)
    dual = raw if regularization else jax.nn.softplus(raw)
    xf = jnp.asarray(x, jnp.float32)
    dual_loss = (dual * (inequality_zero - xf)).astype(x.dtype)
    reg_loss = (dual * xf).astype(x.dtype)
    return dual_loss, reg_loss


if __name__ == "__main__":
    key = jax.random.PRNGKey(0)
    k1, k2, k3 = jax.random.split(key, 3)

    # Deterministic parameter init: Learnable(dual=1.0, positive=True) stores
    # raw = inverse_softplus(1.0) so that dual() == 1.0.
    dual_init = 1.0
    raw_dual = math.log(math.expm1(dual_init))
    inequality_zero = 0.1

    # 1) Constraint mode, lane-dense f32 input, kernel path forced.
    x = jax.random.normal(k1, (16, 256), dtype=jnp.float32)
    dual_loss, reg_loss = lagrangian_loss(
        x, raw_dual, inequality_zero=inequality_zero, regularization=False,
        small_tensor_bytes=0)
    jax.block_until_ready((dual_loss, reg_loss))
    ref_dual, ref_reg = _reference(x, raw_dual, inequality_zero, False)
    assert jnp.allclose(dual_loss, ref_dual, rtol=1e-5, atol=1e-5)
    assert jnp.allclose(reg_loss, ref_reg, rtol=1e-5, atol=1e-5)

    # 2) Regularization mode (dual is a plain constant, no softplus).
    r_dual, r_reg = lagrangian_loss(
        x, 0.25, inequality_zero=inequality_zero, regularization=True,
        small_tensor_bytes=0)
    jax.block_until_ready((r_dual, r_reg))
    rr_dual, rr_reg = _reference(x, 0.25, inequality_zero, True)
    assert jnp.allclose(r_dual, rr_dual, rtol=1e-5, atol=1e-5)
    assert jnp.allclose(r_reg, rr_reg, rtol=1e-5, atol=1e-5)

    # 3) bf16, non-lane-dense shape -> flattened/padded lane-dense kernel path.
    xb = jax.random.normal(k2, (7, 60), dtype=jnp.bfloat16)
    b_dual, b_reg = lagrangian_loss(
        xb, raw_dual, inequality_zero=inequality_zero, regularization=False,
        small_tensor_bytes=0)
    jax.block_until_ready((b_dual, b_reg))
    rb_dual, rb_reg = _reference(xb, raw_dual, inequality_zero, False)
    assert b_dual.shape == xb.shape and b_dual.dtype == xb.dtype
    assert jnp.allclose(b_dual.astype(jnp.float32), rb_dual.astype(jnp.float32),
                        rtol=1e-2, atol=1e-2)
    assert jnp.allclose(b_reg.astype(jnp.float32), rb_reg.astype(jnp.float32),
                        rtol=1e-2, atol=1e-2)

    # 4) Moderate array (~2.5 MiB) -> multi-step grid (both v7x cores get work).
    xm = jax.random.normal(k3, (1024, 640), dtype=jnp.float32)
    m_dual, m_reg = lagrangian_loss(
        xm, raw_dual, inequality_zero=inequality_zero, regularization=False)
    jax.block_until_ready((m_dual, m_reg))
    rm_dual, rm_reg = _reference(xm, raw_dual, inequality_zero, False)
    assert jnp.allclose(m_dual, rm_dual, rtol=1e-5, atol=1e-5)
    assert jnp.allclose(m_reg, rm_reg, rtol=1e-5, atol=1e-5)

    # 5) Trivial branch (inequality_zero == 0, constraint mode) -> empty Loss().
    z_dual, z_reg = lagrangian_loss(x, raw_dual, inequality_zero=0.0,
                                    regularization=False)
    jax.block_until_ready((z_dual, z_reg))
    assert jnp.all(z_dual == 0) and jnp.all(z_reg == 0)

    # 6) Small-tensor bail-out path (default threshold) matches too.
    s_dual, s_reg = lagrangian_loss(
        x, raw_dual, inequality_zero=inequality_zero, regularization=False)
    jax.block_until_ready((s_dual, s_reg))
    assert jnp.allclose(s_dual, ref_dual, rtol=1e-5, atol=1e-5)
    assert jnp.allclose(s_reg, ref_reg, rtol=1e-5, atol=1e-5)

    print("KERNEL_OK")
</pallas_src>

<mosaic_0001>
module attributes {stable_mosaic.version = 11 : i64} {
  func.func @_lagrangian_kernel(%arg0: i32, %arg1: i32, %arg2: memref<2xf32, #tpu.memory_space<smem>>, %arg3: memref<16x256xf32, #tpu.memory_space<vmem>>, %arg4: memref<16x256xf32, #tpu.memory_space<vmem>>, %arg5: memref<16x256xf32, #tpu.memory_space<vmem>>) attributes {dimension_semantics = [#tpu.dimension_semantics<parallel>, #tpu.dimension_semantics<parallel>], iteration_bounds = array<i64: 1, 1>, scalar_prefetch = 1 : i64, scratch_operands = 0 : i64, tpu.core_type = #tpu.core_type<tc>, window_params = [{transform_indices = @transform_0, window_bounds = array<i64: 16, 256>}, {transform_indices = @transform_1, window_bounds = array<i64: 16, 256>}, {transform_indices = @transform_2, window_bounds = array<i64: 16, 256>}]} {
    %c0 = arith.constant 0 : index
    %0 = memref.load %arg2[%c0] : memref<2xf32, #tpu.memory_space<smem>>
    %c1 = arith.constant 1 : index
    %1 = memref.load %arg2[%c1] : memref<2xf32, #tpu.memory_space<smem>>
    %c0_0 = arith.constant 0 : index
    %c0_1 = arith.constant 0 : index
    %2 = vector.load %arg3[%c0_0, %c0_1] : memref<16x256xf32, #tpu.memory_space<vmem>>, vector<16x256xf32>
    %3 = vector.broadcast %0 : f32 to vector<16x256xf32>
    %4 = arith.mulf %3, %2 : vector<16x256xf32>
    %c0_2 = arith.constant 0 : index
    %c0_3 = arith.constant 0 : index
    %5 = vector.load %arg5[%c0_2, %c0_3] : memref<16x256xf32, #tpu.memory_space<vmem>>, vector<16x256xf32>
    tpu.vector_store %arg5[%c0_2, %c0_3], %4 {strides = array<i32>} : memref<16x256xf32, #tpu.memory_space<vmem>>, vector<16x256xf32>,
    %6 = vector.broadcast %1 : f32 to vector<16x256xf32>
    %7 = arith.subf %6, %4 : vector<16x256xf32>
    %c0_4 = arith.constant 0 : index
    %c0_5 = arith.constant 0 : index
    %8 = vector.load %arg4[%c0_4, %c0_5] : memref<16x256xf32, #tpu.memory_space<vmem>>, vector<16x256xf32>
    tpu.vector_store %arg4[%c0_4, %c0_5], %7 {strides = array<i32>} : memref<16x256xf32, #tpu.memory_space<vmem>>, vector<16x256xf32>,
    return
  }
  func.func @transform_0(%arg0: i32, %arg1: i32, %arg2: memref<2xf32, #tpu.memory_space<smem>>) -> (i32, i32) {
    %c0_i32 = arith.constant 0 : i32
    return %arg0, %arg1 : i32, i32
  }
  func.func @transform_1(%arg0: i32, %arg1: i32, %arg2: memref<2xf32, #tpu.memory_space<smem>>) -> (i32, i32) {
    %c0_i32 = arith.constant 0 : i32
    return %arg0, %arg1 : i32, i32
  }
  func.func @transform_2(%arg0: i32, %arg1: i32, %arg2: memref<2xf32, #tpu.memory_space<smem>>) -> (i32, i32) {
    %c0_i32 = arith.constant 0 : i32
    return %arg0, %arg1 : i32, i32
  }
}

</mosaic_0001>

<bundles_post_ra>
// kernel: tpu_custom_call.1
= control target key start
LH: loop header
LB: loop body
LE: loop exit
PB: predicated region body
PF: predicated region fallthrough
CT: control target
= control target key end

     0   :  { %s269_s0 = inlined_call_operand.hbm [shape: f32[2], index: 0, kind: input, shape index: {}]   ;;  %s270_s1 = inlined_call_operand.hbm [shape: f32[16,256], index: 1, kind: input, shape index: {}]   ;;  %s271_s2 = inlined_call_operand.hbm [shape: f32[16,256], index: 2, kind: output, shape index: {0}]   ;;  %s272_s3 = inlined_call_operand.hbm [shape: f32[16,256], index: 3, kind: output, shape index: {1}]  }
   0x1   :  { %s95_s14 = scalar_lea.hbm %s269_s0, 16 }
   0x2   :  { %p96_p0 = scmp.ne.s32.totalorder %s269_s0, %s95_s14  ;;  %p99_p1 = scmp.lt.u32.totalorder %s95_s14, %s269_s0 }
   0x4   :  { %p101_p2 = pnand %p99_p1, %p96_p0 }
   0x6   :  { %104 = shalt.err (!%p101_p2)  }
   0x7   :  { %s179_s19 = smov [#allocation3]  }
   0x8   :  { %10 = dma.hbm_to_smem %s269_s0, 16, %s179_s19, [#allocation2] }
   0x9   :  { %171 = dma.done.wait [#allocation2], 16 }
   0xa   :  { %172 = vsyncadd [#allocation2], 4294967280 }
   0xb   :  { %12 = sfence }
   0xc   :  { %13 = vsyncpa [#allocation5], 0 }
   0xd   :  { %14 = vsyncpa [#allocation6], 0 }
   0xe   :  { %15 = vsyncpa [#allocation9], 0  ;;  %s180_s22 = smov [#allocation4]   ;;  %s105_s26 = scalar_lea.hbm %s270_s1, 512 }
   0xf   :  { %s21_s23 = sshll.u32 %s180_s22, 4  ;;  %p106_p3 = scmp.ne.s32.totalorder %s270_s1, %s105_s26  ;;  %s22_s23 = int_to_ptr.vmem [resolvable:$true] %s21_s23 }
  0x10   :  { %p109_p4 = scmp.lt.u32.totalorder %s105_s26, %s270_s1 }
  0x12   :  { %p111_p5 = pnand %p109_p4, %p106_p3 }
  0x14   :  { %114 = shalt.err (!%p111_p5)
}
  0x15   :  { %s115_s0 = scalar_lea.vmem %s22_s23, 512  ;;  %p120_p7 = scmp.lt.s32.totalorder %s22_s23, %s22_s23 }
  0x16   :  { %p116_p6 = scmp.ne.s32.totalorder %s22_s23, %s115_s0  ;;  %p121_p8 = scmp.lt.s32.totalorder %s115_s0, %s115_s0 }
  0x18   :  { %p122_p9 = por %p121_p8, %p120_p7 }
  0x1a   :  { %p123_p10 = pnand %p122_p9, %p116_p6 }
  0x1c   :  { %126 = shalt.err (!%p123_p10)
}
  0x1d   :  { %s181_s4 = smov 256   ;;  %s182_s5 = smov 16  }
  0x1e   :  { %27 = dma.hbm_to_vmem [thread:$0]  %s270_s1, 512, %s22_s23, [#allocation5], %s181_s4, %s181_s4, %s182_s5  }
  0x1f   :  { %173 = dma.done.wait [#allocation5], 512  }
  0x20   :  { %174 = vsyncadd [#allocation5], 4294966784  ;;  %s31_s8 = sld [smem:[#allocation3]]  ;;  %s88_s9 = sld [smem:[#allocation3 + $0x1]]  ;;  %v33_v0 = vld [vmem:[#allocation4] sm:$0xff]  ;;  %v34_v2 = vld [vmem:[#allocation4 + $0x8] sm:$0xff] }
  0x21   :  { %s183_s10 = smov [#allocation8]   ;;  %v35_v3 = vld [vmem:[#allocation4 + $0x10] sm:$0xff]  ;;  %v36_v8 = vld [vmem:[#allocation4 + $0x18] sm:$0xff]  ;;  %s184_s12 = smov [#allocation7]  }
  0x22   :  { %s72_s11 = sshll.u32 %s183_s10, 4  ;;  %s60_s13 = sshll.u32 %s184_s12, 4  ;;  %s73_s11 = int_to_ptr.vmem [resolvable:$true] %s72_s11  ;;  %s232_s13 = int_to_ptr.vmem [resolvable:$true] %s60_s13 }
  0x23   :  { %s127_s1 = scalar_lea.vmem %s73_s11, 512  ;;  %p132_p12 = scmp.lt.s32.totalorder %s73_s11, %s73_s11 }
  0x24   :  { %p128_p11 = scmp.ne.s32.totalorder %s73_s11, %s127_s1  ;;  %p133_p13 = scmp.lt.s32.totalorder %s127_s1, %s127_s1 }
  0x26   :  { %v37_v1 = vstv %s31_s8  ;;  %v46_v4 = vstv %s88_s9  ;;  %p134_p0 = por %p133_p13, %p132_p12 }
  0x27   :  { %v38_v5 = vmul.f32 %v37_v1, %v33_v0  ;;  %v39_v6 = vmul.f32 %v37_v1, %v34_v2  ;;  %v40_v7 = vmul.f32 %v37_v1, %v35_v3  ;;  %v41_v9 = vmul.f32 %v37_v1, %v36_v8 }
  0x28   :  { %p135_p1 = pnand %p134_p0, %p128_p11 }
  0x29   :  { %42 = vst [vmem:[#allocation8] sm:$0xff] %v38_v5  ;;  %43 = vst [vmem:[#allocation8 + $0x8] sm:$0xff] %v39_v6  ;;  %v47_v10 = vsub.f32 %v46_v4, %v38_v5  ;;  %v48_v11 = vsub.f32 %v46_v4, %v39_v6  ;;  %v49_v12 = vsub.f32 %v46_v4, %v40_v7 }
  0x2a   :  { %44 = vst [vmem:[#allocation8 + $0x10] sm:$0xff] %v40_v7  ;;  %45 = vst [vmem:[#allocation8 + $0x18] sm:$0xff] %v41_v9  ;;  %v50_v13 = vsub.f32 %v46_v4, %v41_v9 }
  0x2b   :  { %51 = vst [vmem:[#allocation7] sm:$0xff] %v47_v10  ;;  %52 = vst [vmem:[#allocation7 + $0x8] sm:$0xff] %v48_v11 }
  0x2c   :  { %53 = vst [vmem:[#allocation7 + $0x10] sm:$0xff] %v49_v12 }
  0x2d   :  { %138 = shalt.err (!%p135_p1)
}
  0x2e   :  { %s139_s16 = scalar_lea.hbm %s272_s3, 512 }
  0x2f   :  { %p140_p2 = scmp.ne.s32.totalorder %s272_s3, %s139_s16  ;;  %p143_p3 = scmp.lt.u32.totalorder %s139_s16, %s272_s3 }
  0x31   :  { %p145_p4 = pnand %p143_p3, %p140_p2 }
  0x33   :  { %148 = shalt.err (!%p145_p4)
}
  0x34   :  { %78 = dma.vmem_to_hbm [thread:$0]  %s73_s11, 512, %s272_s3, [#allocation9], %s181_s4, %s181_s4, %s182_s5   ;;  %54 = vst [vmem:[#allocation7 + $0x18] sm:$0xff] %v50_v13 }
  0x35   :  { %s149_s23 = scalar_lea.vmem %s232_s13, 512  ;;  %p154_p6 = scmp.lt.s32.totalorder %s232_s13, %s232_s13 }
  0x36   :  { %p150_p5 = scmp.ne.s32.totalorder %s232_s13, %s149_s23  ;;  %p155_p7 = scmp.lt.s32.totalorder %s149_s23, %s149_s23 }
  0x38   :  { %p156_p8 = por %p155_p7, %p154_p6 }
  0x3a   :  { %p157_p9 = pnand %p156_p8, %p150_p5 }
  0x3c   :  { %160 = shalt.err (!%p157_p9)
}
  0x3d   :  { %s161_s26 = scalar_lea.hbm %s271_s2, 512 }
  0x3e   :  { %p162_p10 = scmp.ne.s32.totalorder %s271_s2, %s161_s26  ;;  %p165_p11 = scmp.lt.u32.totalorder %s161_s26, %s271_s2 }
  0x40   :  { %p167_p12 = pnand %p165_p11, %p162_p10 }
  0x42   :  { %170 = shalt.err (!%p167_p12)
}
  0x43   :  { %66 = dma.vmem_to_hbm [thread:$0]  %s232_s13, 512, %s271_s2, [#allocation6], %s181_s4, %s181_s4, %s182_s5  }
  0x44   :  { %175 = dma.done.wait [#allocation6], 512  }
  0x45   :  { %176 = vsyncadd [#allocation6], 4294966784 }
  0x46   :  { %177 = dma.done.wait [#allocation9], 512  }
  0x47   :  { %178 = vsyncadd [#allocation9], 4294966784 }
  0x48   :  { %85 = vsyncpa [#allocation5], 1 }
  0x49   :  { %86 = vsyncpa [#allocation6], 1 }
  0x4a   :  { %87 = vsyncpa [#allocation9], 1 }

</bundles_post_ra>
